<compile_context>
chip_gen: v5e
topology: v5e:2x2
jax: 0.10.0
libtpu: 0.0.40
codegen_flags: <defaults>
</compile_context>

<pallas_src>
import jax
import jax.numpy as jnp
from jax.experimental import pallas as pl
from jax.experimental.pallas import tpu as pltpu


def _round_up(a: int, m: int) -> int:
    return (a + m - 1) // m * m


def _cdiv(a: int, b: int) -> int:
    return (a + b - 1) // b


# ----------------------------- kernels --------------------------------------


def _dense_tanh_kernel_kloop(x_ref, w_ref, b_ref, o_ref, acc_ref):
    # grid = (N tiles, M tiles, K tiles); K is the innermost ("arbitrary") axis.
    k = pl.program_id(2)
    prod = jnp.dot(x_ref[...], w_ref[...], preferred_element_type=jnp.float32)

    @pl.when(k == 0)
    def _():
        acc_ref[...] = prod            # first K step writes directly (no zero-fill)

    @pl.when(k != 0)
    def _():
        acc_ref[...] += prod

    @pl.when(k == pl.num_programs(2) - 1)
    def _():
        o_ref[...] = jnp.tanh(acc_ref[...] + b_ref[...]).astype(o_ref.dtype)


def _dense_tanh_kernel_single(x_ref, w_ref, b_ref, o_ref):
    # Single K step: no accumulator scratch needed at all.
    acc = jnp.dot(x_ref[...], w_ref[...], preferred_element_type=jnp.float32)
    o_ref[...] = jnp.tanh(acc + b_ref[...]).astype(o_ref.dtype)


# ----------------------------- wrapper ---------------------------------------


def make_dense_tanh(weight, bias, *, param_dtype=jnp.bfloat16,
                    small_fallback=True, tiny_elems=1 << 16):
    """Build an `apply(x) -> tanh(x @ weight.T + bias)` closure.

    weight: [out_features, in_features]   (PyTorch nn.Linear layout)
    bias:   [out_features]

    Weight transpose / dtype cast / padding is done ONCE here (model-load time);
    per call only x is padded.
    """
    N, K = weight.shape
    w_dtype = jnp.dtype(param_dtype)
    itemsize = w_dtype.itemsize
    # Sublane granularity: 8 rows for 4-byte dtypes, 16 for 2-byte, 32 for 1-byte.
    msub = {4: 8, 2: 16, 1: 32}.get(itemsize, 8)

    # ---- N / K tiling, fixed at load time ----
    n128 = _round_up(N, 128)
    tn = min(n128, 1024)                      # lane-dense, capped (v5e vst / v7x VMEM)
    tn = _round_up(tn, 128)
    n_pad = _round_up(n128, tn)

    k128 = _round_up(K, 128)                  # always 128-align the contraction dim
    tk = k128 if k128 <= 2048 else 1024
    k_pad = _round_up(k128, tk)
    nk = k_pad // tk

    # ---- hoist weight/bias prep out of the per-call path ----
    w_t = jnp.asarray(weight, w_dtype).T                       # [K, N]
    w_pad = jnp.pad(w_t, ((0, k_pad - K), (0, n_pad - N)))     # padded once
    b_f32 = jnp.asarray(bias, jnp.float32)
    b_pad = jnp.pad(b_f32, (0, n_pad - N)).reshape(1, n_pad)   # f32 epilogue bias

    def apply(x, *, force_pallas=False):
        batch, k_in = x.shape
        assert k_in == K, "x must be [batch, in_features]"
        out_dtype = x.dtype

        # Tiny shapes: the kernel is pure fixed overhead -> let XLA fuse it.
        if small_fallback and not force_pallas and batch * K * N < tiny_elems:
            return jnp.tanh(
                jnp.dot(x.astype(w_dtype), w_t,
                        preferred_element_type=jnp.float32) + b_f32
            ).astype(out_dtype)

        # Balanced M tiling: avoids a second, almost-all-padding tile.
        tm = _round_up(_cdiv(batch, _cdiv(batch, 512)), msub)
        m_pad = _round_up(batch, tm)

        x_c = x.astype(w_dtype)
        if (m_pad, k_pad) != (batch, K):
            x_c = jnp.pad(x_c, ((0, m_pad - batch), (0, k_pad - K)))

        grid_m = m_pad // tm
        grid_n = n_pad // tn

        # VMEM budget: double-buffered x/w/out tiles + acc + bias + 2x headroom,
        # capped at 48 MiB so v7x's 64 MiB/core keeps compiler-internal slack.
        est = (2 * (tm * tk + tk * tn) * itemsize
               + 2 * tn * 4
               + 2 * tm * tn * jnp.dtype(out_dtype).itemsize
               + (tm * tn * 4 if nk > 1 else 0))
        vmem_limit = int(min(max(2 * est, 32 << 20), 48 << 20))

        if nk == 1:
            out_p = pl.pallas_call(
                _dense_tanh_kernel_single,
                out_shape=jax.ShapeDtypeStruct((m_pad, n_pad), out_dtype),
                grid_spec=pltpu.PrefetchScalarGridSpec(
                    num_scalar_prefetch=0,
                    grid=(grid_n, grid_m),          # N outermost: megacore splits weight
                    in_specs=[
                        pl.BlockSpec((tm, tk), lambda j, i: (i, 0)),
                        pl.BlockSpec((tk, tn), lambda j, i: (0, j)),
                        pl.BlockSpec((1, tn), lambda j, i: (0, j)),
                    ],
                    out_specs=pl.BlockSpec((tm, tn), lambda j, i: (i, j)),
                ),
                compiler_params=pltpu.CompilerParams(
                    dimension_semantics=("parallel", "parallel"),
                    vmem_limit_bytes=vmem_limit,
                ),
            )(x_c, w_pad, b_pad)
        else:
            out_p = pl.pallas_call(
                _dense_tanh_kernel_kloop,
                out_shape=jax.ShapeDtypeStruct((m_pad, n_pad), out_dtype),
                grid_spec=pltpu.PrefetchScalarGridSpec(
                    num_scalar_prefetch=0,
                    grid=(grid_n, grid_m, nk),      # K innermost (reduction)
                    in_specs=[
                        pl.BlockSpec((tm, tk), lambda j, i, k: (i, k)),
                        pl.BlockSpec((tk, tn), lambda j, i, k: (k, j)),
                        pl.BlockSpec((1, tn), lambda j, i, k: (0, j)),
                    ],
                    out_specs=pl.BlockSpec((tm, tn), lambda j, i, k: (i, j)),
                    scratch_shapes=[pltpu.VMEM((tm, tn), jnp.float32)],
                ),
                compiler_params=pltpu.CompilerParams(
                    dimension_semantics=("parallel", "parallel", "arbitrary"),
                    vmem_limit_bytes=vmem_limit,
                ),
            )(x_c, w_pad, b_pad)

        return out_p[:batch, :N]

    return jax.jit(apply, static_argnames=("force_pallas",))


# TODO(synk): the module's dict-update / save / load / config plumbing has no
# compute content and is not translated; only the forward math is implemented.


if __name__ == "__main__":
    # ---- Test 1: small shapes of the module (f32 params, force Pallas path) ----
    batch, in_features, out_features = 8, 32, 64
    k_x, k_w, k_b = jax.random.split(jax.random.PRNGKey(0), 3)
    bound = 1.0 / jnp.sqrt(jnp.float32(in_features))
    weight = jax.random.uniform(k_w, (out_features, in_features),
                                jnp.float32, -bound, bound)   # PyTorch [out, in]
    bias = jax.random.uniform(k_b, (out_features,), jnp.float32, -bound, bound)
    x = jax.random.normal(k_x, (batch, in_features), jnp.float32)

    dense_f32 = make_dense_tanh(weight, bias, param_dtype=jnp.float32,
                                small_fallback=False)
    out = jax.block_until_ready(dense_f32(x))
    ref = jnp.tanh(jnp.matmul(x, weight.T,
                              precision=jax.lax.Precision.HIGHEST) + bias)
    assert out.shape == (batch, out_features)
    assert jnp.allclose(out, ref, atol=1e-5, rtol=1e-5), "mismatch (f32 small case)"

    # ---- Test 2: ragged batch, realistic dims, default bf16 weight feeding ----
    b2, in2, out2 = 300, 384, 768
    k_x2, k_w2, k_b2 = jax.random.split(jax.random.PRNGKey(1), 3)
    bound2 = 1.0 / jnp.sqrt(jnp.float32(in2))
    w2 = jax.random.uniform(k_w2, (out2, in2), jnp.float32, -bound2, bound2)
    bias2 = jax.random.uniform(k_b2, (out2,), jnp.float32, -bound2, bound2)
    x2 = jax.random.normal(k_x2, (b2, in2), jnp.float32)

    dense_bf16 = make_dense_tanh(w2, bias2)            # param_dtype=bf16 default
    out2_ = jax.block_until_ready(dense_bf16(x2))
    ref2 = jnp.tanh(jnp.matmul(x2, w2.T,
                               precision=jax.lax.Precision.HIGHEST) + bias2)
    assert out2_.shape == (b2, out2)
    assert jnp.allclose(out2_, ref2, atol=2e-2, rtol=2e-2), "mismatch (bf16 case)"

    # ---- Test 3: K > 2048 exercises the multi-K accumulator kernel ----
    b3, in3, out3 = 64, 2304, 256
    k_x3, k_w3, k_b3 = jax.random.split(jax.random.PRNGKey(2), 3)
    bound3 = 1.0 / jnp.sqrt(jnp.float32(in3))
    w3 = jax.random.uniform(k_w3, (out3, in3), jnp.float32, -bound3, bound3)
    bias3 = jax.random.uniform(k_b3, (out3,), jnp.float32, -bound3, bound3)
    x3 = jax.random.normal(k_x3, (b3, in3), jnp.float32)

    dense_big_k = make_dense_tanh(w3, bias3)           # bf16, nk = 3 K-steps
    out3_ = jax.block_until_ready(dense_big_k(x3))
    ref3 = jnp.tanh(jnp.matmul(x3, w3.T,
                               precision=jax.lax.Precision.HIGHEST) + bias3)
    assert out3_.shape == (b3, out3)
    assert jnp.allclose(out3_, ref3, atol=2e-2, rtol=2e-2), "mismatch (multi-K case)"

    print("KERNEL_OK")
</pallas_src>

<mosaic_0001>
module attributes {stable_mosaic.version = 11 : i64} {
  func.func @_dense_tanh_kernel_single(%arg0: i32, %arg1: i32, %arg2: memref<8x128xf32, #tpu.memory_space<vmem>>, %arg3: memref<128x128xf32, #tpu.memory_space<vmem>>, %arg4: memref<1x128xf32, #tpu.memory_space<vmem>>, %arg5: memref<8x128xf32, #tpu.memory_space<vmem>>) attributes {dimension_semantics = [#tpu.dimension_semantics<parallel>, #tpu.dimension_semantics<parallel>], iteration_bounds = array<i64: 1, 1>, scalar_prefetch = 0 : i64, scratch_operands = 0 : i64, tpu.core_type = #tpu.core_type<tc>, window_params = [{transform_indices = @transform_0, window_bounds = array<i64: 8, 128>}, {transform_indices = @transform_1, window_bounds = array<i64: 128, 128>}, {transform_indices = @transform_2, window_bounds = array<i64: 1, 128>}, {transform_indices = @transform_3, window_bounds = array<i64: 8, 128>}]} {
    %c0 = arith.constant 0 : index
    %c0_0 = arith.constant 0 : index
    %0 = vector.load %arg2[%c0, %c0_0] : memref<8x128xf32, #tpu.memory_space<vmem>>, vector<8x128xf32>
    %c0_1 = arith.constant 0 : index
    %c0_2 = arith.constant 0 : index
    %1 = vector.load %arg3[%c0_1, %c0_2] : memref<128x128xf32, #tpu.memory_space<vmem>>, vector<128x128xf32>
    %cst = arith.constant dense<0.000000e+00> : vector<8x128xf32>
    %2 = tpu.matmul %0, %1, %cst {dimension_numbers = #tpu.dot_dimension_numbers<[1], [0], [0], [1], [0, 0, 1, 1], [], []>} : vector<8x128xf32>, vector<128x128xf32>, vector<8x128xf32> -> vector<8x128xf32>
    %c0_3 = arith.constant 0 : index
    %c0_4 = arith.constant 0 : index
    %3 = vector.load %arg4[%c0_3, %c0_4] : memref<1x128xf32, #tpu.memory_space<vmem>>, vector<1x128xf32>
    %4 = vector.broadcast %3 : vector<1x128xf32> to vector<8x128xf32>
    %5 = arith.addf %2, %4 : vector<8x128xf32>
    %6 = math.tanh %5 : vector<8x128xf32>
    %c0_5 = arith.constant 0 : index
    %c0_6 = arith.constant 0 : index
    %7 = vector.load %arg5[%c0_5, %c0_6] : memref<8x128xf32, #tpu.memory_space<vmem>>, vector<8x128xf32>
    tpu.vector_store %arg5[%c0_5, %c0_6], %6 {strides = array<i32>} : memref<8x128xf32, #tpu.memory_space<vmem>>, vector<8x128xf32>,
    return
  }
  func.func @transform_0(%arg0: i32, %arg1: i32) -> (i32, i32) {
    %c0_i32 = arith.constant 0 : i32
    %c0_i32_0 = arith.constant 0 : i32
    return %arg1, %c0_i32 : i32, i32
  }
  func.func @transform_1(%arg0: i32, %arg1: i32) -> (i32, i32) {
    %c0_i32 = arith.constant 0 : i32
    %c0_i32_0 = arith.constant 0 : i32
    return %c0_i32, %arg0 : i32, i32
  }
  func.func @transform_2(%arg0: i32, %arg1: i32) -> (i32, i32) {
    %c0_i32 = arith.constant 0 : i32
    %c0_i32_0 = arith.constant 0 : i32
    return %c0_i32, %arg0 : i32, i32
  }
  func.func @transform_3(%arg0: i32, %arg1: i32) -> (i32, i32) {
    %c0_i32 = arith.constant 0 : i32
    return %arg1, %arg0 : i32, i32
  }
}

</mosaic_0001>

<bundles_post_ra>
// kernel: apply.1
= control target key start
LH: loop header
LB: loop body
LE: loop exit
PB: predicated region body
PF: predicated region fallthrough
CT: control target
= control target key end

     0   :  { %8 = vsyncpa [#allocation3], 0  ;;  %s186_s0 = inlined_call_operand.vmem [shape: f32[8,128], index: 0, kind: input, shape index: {}]   ;;  %s187_s1 = inlined_call_operand.hbm [shape: f32[128,128], index: 1, kind: input, shape index: {}]   ;;  %s188_s2 = inlined_call_operand.vmem [shape: f32[1,128], index: 2, kind: input, shape index: {}]   ;;  %s189_s3 = inlined_call_operand.hbm [shape: f32[8,128], index: 3, kind: output, shape index: {}]  }
   0x1   :  { %9 = vsyncpa [#allocation4], 0  ;;  %s16_s14 = sshll.u32 %s187_s1, 4  ;;  %s150_s15 = smov [#allocation2]   ;;  %s17_s14 = int_to_ptr.hbm [resolvable:$true] %s16_s14 }
   0x2   :  { %s18_s16 = sshll.u32 %s150_s15, 4  ;;  %s151_s17 = smov 128   ;;  %s19_s16 = int_to_ptr.vmem [resolvable:$true] %s18_s16 }
   0x3   :  { %s152_s18 = smov 8  }
   0x4   :  { %24 = dma.hbm_to_vmem [thread:$0]  %s17_s14, 2048, %s19_s16, [#allocation3], %s151_s17, %s151_s17, %s152_s18  }
   0x5   :  { %146 = dma.done.wait [#allocation3], 2048  }
   0x6   :  { %147 = vsyncadd [#allocation3], 4294965248  ;;  %v47_v0 = vld [vmem:[#allocation2 + $0x78] sm:$0xff]  ;;  %v46_v1 = vld [vmem:[#allocation2 + $0x70] sm:$0xff]  ;;  %s153_s22 = smov [#allocation5]   ;;  %s81_s26 = sshll.u32 %s189_s3, 4  ;;  %s82_s26 = int_to_ptr.hbm [resolvable:$true] %s81_s26 }
   0x7   :  { %52 = vmatpush.msra.mxu0 %v47_v0  ;;  %v45_v2 = vld [vmem:[#allocation2 + $0x68] sm:$0xff]  ;;  %v44_v3 = vld [vmem:[#allocation2 + $0x60] sm:$0xff]  ;;  %v43_v4 = vld [vmem:[#allocation2 + $0x58] sm:$0xff]  ;;  %s79_s23 = sshll.u32 %s153_s22, 4  ;;  %s80_s23 = int_to_ptr.vmem [resolvable:$true] %s79_s23 }
   0x8   :  { %v42_v5 = vld [vmem:[#allocation2 + $0x50] sm:$0xff]  ;;  %v41_v6 = vld [vmem:[#allocation2 + $0x48] sm:$0xff]  ;;  %v40_v7 = vld [vmem:[#allocation2 + $0x40] sm:$0xff] }
   0x9   :  { %53 = vmatpush.msra.mxu0 %v46_v1  ;;  %v39_v8 = vld [vmem:[#allocation2 + $0x38] sm:$0xff]  ;;  %v38_v9 = vld [vmem:[#allocation2 + $0x30] sm:$0xff]  ;;  %v37_v10 = vld [vmem:[#allocation2 + $0x28] sm:$0xff] }
   0xa   :  { %v36_v11 = vld [vmem:[#allocation2 + $0x20] sm:$0xff]  ;;  %v35_v12 = vld [vmem:[#allocation2 + $0x18] sm:$0xff]  ;;  %v34_v13 = vld [vmem:[#allocation2 + $0x10] sm:$0xff] }
   0xb   :  { %54 = vmatpush.msra.mxu0 %v45_v2  ;;  %v33_v14 = vld [vmem:[#allocation2 + $0x8] sm:$0xff]  ;;  %v32_v15 = vld [vmem:[#allocation2] sm:$0xff] }
   0xc   :  { %v31_v16 = vld [vmem:[%s186_s0] sm:$0xff] }
   0xd   :  { %55 = vmatpush.msra.mxu0 %v44_v3  ;;  %v95_v17 = vld [vmem:[%s188_s2] ss:$0 sm:$0xff] }
   0xf   :  { %56 = vmatpush.msra.mxu0 %v43_v4 }
  0x11   :  { %57 = vmatpush.msra.mxu0 %v42_v5 }
  0x13   :  { %58 = vmatpush.msra.mxu0 %v41_v6 }
  0x15   :  { %59 = vmatpush.msra.mxu0 %v40_v7 }
  0x17   :  { %60 = vmatpush.msra.mxu0 %v39_v8 }
  0x19   :  { %61 = vmatpush.msra.mxu0 %v38_v9 }
  0x1b   :  { %62 = vmatpush.msra.mxu0 %v37_v10 }
  0x1d   :  { %63 = vmatpush.msra.mxu0 %v36_v11 }
  0x1f   :  { %64 = vmatpush.msra.mxu0 %v35_v12 }
  0x21   :  { %65 = vmatpush.msra.mxu0 %v34_v13 }
  0x23   :  { %66 = vmatpush.msra.mxu0 %v33_v14 }
  0x25   :  { %67 = vmatpush.msra.mxu0 %v32_v15 }
  0x26   :  { %68 = vmatmul.f32.vlgmr.msra.gmra.mxu0 %v31_v16 }
  0xa3   :  { %v69_v18 = vpop.f32.mrf.mxu0 }
  0xa4   :  { %v70_v19 = vadd.f32 %v95_v17, %v69_v18 }
  0xa6   :  { %96 = vtanh.f32 %v70_v19 }
  0xac   :  { %v97_v20 = vpop.eup %96 }
  0xad   :  { %73 = vst [vmem:[#allocation5] sm:$0xff] %v97_v20 }
  0xae   :  { %84 = dma.vmem_to_hbm [thread:$0]  %s80_s23, 128, %s82_s26, [#allocation4]  }
  0xaf   :  { %148 = dma.done.wait [#allocation4], 128  }
  0xb0   :  { %149 = vsyncadd [#allocation4], 4294967168 }
  0xb1   :  { %89 = vsyncpa [#allocation3], 1 }
  0xb2   :  { %90 = vsyncpa [#allocation4], 1 }

</bundles_post_ra>
